<compile_context>
chip_gen: v6e
topology: v6e:2x2x1
jax: 0.10.0
libtpu: 0.0.40
codegen_flags: <defaults>
</compile_context>

<pallas_src>
import jax
import jax.numpy as jnp
from jax.experimental import pallas as pl
from jax.experimental.pallas import tpu as pltpu


def _round_up(x, m):
    return ((x + m - 1) // m) * m


# ----------------------------- Pallas kernel -------------------------------- #
def _detector_kernel(x_ref, w_ref, b_ref, out_ref, acc_ref):
    """One patch tile: fused matmul -> +bias -> square -> column-sum accumulate.

    x_ref:   [TP, D]        patches tile (f32 or bf16)
    w_ref:   [D, W_pad]     fused weights (teacher-diff | centered students | 0-pad)
    b_ref:   [1, W_pad]     fused biases (f32)
    out_ref: [1, 1, W_pad]  per-shard column sums (written at last reduction step)
    acc_ref: [1, W_pad]     f32 VMEM vector accumulator
    """
    j = pl.program_id(1)

    @pl.when(j == 0)
    def _init():
        acc_ref[...] = jnp.zeros_like(acc_ref)

    # Single lane-dense MXU pass; f32 accumulation and f32 epilogue.
    y = jnp.dot(x_ref[...], w_ref[...], preferred_element_type=jnp.float32)
    y = y + b_ref[...]                                     # [1, W_pad] broadcast
    # Column sums: sublane reduce (XLU slot), stays in the vector datapath.
    acc_ref[...] += jnp.sum(y * y, axis=0, keepdims=True)

    @pl.when(j == pl.num_programs(1) - 1)
    def _finalize():
        out_ref[0] = acc_ref[...]


# ------------------------- host-side weight fusion --------------------------- #
def fuse_detector_weights(t_w, t_b, s_w, s_b, *, use_bf16_matmul=True):
    """Fold (student_mean - teacher) and (student_s - student_mean) into weights.

    Hoist this out of the per-image call path when detector weights are static.
    Returns (w_fused [D, W_pad], b_fused [1, W_pad] f32, num_students, feat_dim).
    """
    t_w = jnp.asarray(t_w, jnp.float32)
    t_b = jnp.asarray(t_b, jnp.float32).reshape(-1)
    s_w = jnp.asarray(s_w, jnp.float32)
    s_b = jnp.asarray(s_b, jnp.float32)
    S, D, F = s_w.shape
    assert t_w.shape == (D, F)
    # Unbiased variance divides by (S - 1); S == 1 would divide by zero
    # (same edge case as torch.var(unbiased=True)).
    assert S >= 2, "predictive uncertainty (unbiased var) needs >= 2 students"

    s_w_mean = jnp.mean(s_w, axis=0)                       # [D, F]
    s_b_mean = jnp.mean(s_b, axis=0)                       # [F]
    w_diff = s_w_mean - t_w                                # regression segment
    b_diff = s_b_mean - t_b
    w_cent = s_w - s_w_mean[None]                          # variance segments
    b_cent = s_b - s_b_mean[None]

    w_all = jnp.concatenate(
        [w_diff[:, None, :], jnp.transpose(w_cent, (1, 0, 2))], axis=1
    ).reshape(D, (S + 1) * F)
    b_all = jnp.concatenate([b_diff[None], b_cent], axis=0).reshape(1, (S + 1) * F)

    # Pad fused output width to a lane-dense multiple of 128 (zero columns
    # contribute nothing to the sums).
    w_tot = (S + 1) * F
    w_pad = _round_up(w_tot, 128)
    if w_pad != w_tot:
        w_all = jnp.pad(w_all, ((0, 0), (0, w_pad - w_tot)))
        b_all = jnp.pad(b_all, ((0, 0), (0, w_pad - w_tot)))

    if use_bf16_matmul:
        w_all = w_all.astype(jnp.bfloat16)   # biases stay f32 (f32 epilogue)

    # The fused weight stays resident in VMEM for the whole grid.  v7x has only
    # 64 MiB/TC; if D*(S+1)*F grows past ~16 MiB, add a column-block grid axis
    # (column partial sums are independent) instead of keeping it resident.
    assert w_all.size * w_all.dtype.itemsize < 16 * 1024 * 1024, (
        "fused weight too large to keep VMEM-resident; tile over columns")
    return w_all, b_all, S, F


# ------------------------------ forward wrappers ----------------------------- #
def detector_forward_fused(patches, w_fused, b_fused, *, num_students, feat_dim,
                           tile_p=2048, num_cores=2):
    """patches: [P, D]; w_fused: [D, W_pad]; b_fused: [1, W_pad] (f32)."""
    patches = jnp.asarray(patches, jnp.float32)
    P, D = patches.shape
    D2, w_pad = w_fused.shape
    assert D2 == D
    S, F = num_students, feat_dim

    # Tile the patch axis with large tiles; rebalance tile size so padding is
    # minimal, and shard the tile loop across a leading "parallel" axis so
    # v7x's two TensorCores split the work (serialized, harmless on v5e/v6e).
    tp_cap = min(tile_p, _round_up(P, 8))
    n_tiles = pl.cdiv(P, tp_cap)
    n_shards = num_cores if n_tiles >= num_cores else 1
    tiles_per_shard = pl.cdiv(n_tiles, n_shards)
    n_tiles = n_shards * tiles_per_shard
    tp = _round_up(pl.cdiv(P, n_tiles), 8)
    p_pad = n_tiles * tp
    if p_pad != P:
        patches = jnp.pad(patches, ((0, p_pad - P), (0, 0)))

    # bf16 operands when the fused weight is bf16 (f32 accumulation in-kernel).
    x_in = patches.astype(jnp.bfloat16) if w_fused.dtype == jnp.bfloat16 else patches

    out = pl.pallas_call(
        _detector_kernel,
        out_shape=jax.ShapeDtypeStruct((n_shards, 1, w_pad), jnp.float32),
        grid_spec=pltpu.PrefetchScalarGridSpec(
            num_scalar_prefetch=0,
            grid=(n_shards, tiles_per_shard),
            in_specs=[
                pl.BlockSpec((tp, D), lambda c, j: (c * tiles_per_shard + j, 0)),
                pl.BlockSpec((D, w_pad), lambda c, j: (0, 0)),   # resident weights
                pl.BlockSpec((1, w_pad), lambda c, j: (0, 0)),   # resident biases
            ],
            out_specs=pl.BlockSpec((1, 1, w_pad), lambda c, j: (c, 0, 0)),
            scratch_shapes=[pltpu.VMEM((1, w_pad), jnp.float32)],
        ),
        compiler_params=pltpu.CompilerParams(
            dimension_semantics=("parallel", "arbitrary"),
            vmem_limit_bytes=32 * 1024 * 1024,   # safe on v5e/v6e/v7x budgets
        ),
    )(x_in, w_fused, b_fused)

    # Finalize in the wrapper: combine per-shard column sums, correct for padded
    # zero rows (each produces exactly y = bias), split segments, divide.
    col = out.sum(axis=(0, 1))                                    # [w_pad]
    pad_rows = p_pad - P
    if pad_rows:
        col = col - float(pad_rows) * (b_fused[0].astype(jnp.float32) ** 2)

    denom = float(P * F)
    regression_error = jnp.sum(col[:F]) / denom
    predictive_uncertainty = jnp.sum(col[F:(S + 1) * F]) / (denom * float(S - 1))
    return regression_error, predictive_uncertainty


def detector_forward(patches, t_w, t_b, s_w, s_b, *, tile_p=2048,
                     use_bf16_matmul=True):
    """Convenience wrapper: fuse weights then run the kernel."""
    w_fused, b_fused, S, F = fuse_detector_weights(
        t_w, t_b, s_w, s_b, use_bf16_matmul=use_bf16_matmul)
    return detector_forward_fused(patches, w_fused, b_fused,
                                  num_students=S, feat_dim=F, tile_p=tile_p)


# ------------------------------- glue (JAX) ---------------------------------- #
def extract_patches(image, patch_size):
    """image: [1, C, H, W] NCHW -> [P, C*p*p], non-overlapping patches."""
    _, C, H, W = image.shape
    p = patch_size
    x = image[0].reshape(C, H // p, p, W // p, p)
    x = jnp.transpose(x, (1, 3, 0, 2, 4))          # [H/p, W/p, C, p, p]
    return x.reshape(-1, C * p * p)                # [P, D]


def reference_forward(patches, t_w, t_b, s_w, s_b):
    """Pure-JAX reference mirroring the PyTorch forward (un-fused formulation)."""
    t = patches @ t_w + t_b                                        # [P, F]
    s = jnp.einsum("pd,sdf->spf", patches, s_w) + s_b[:, None, :]  # [S, P, F]
    teacher_flat = t.reshape(-1)
    student_flat = s.reshape(s.shape[0], -1)
    students_mean = student_flat.mean(axis=0)
    reg_err = jnp.mean((students_mean - teacher_flat) ** 2)
    unc = jnp.mean(jnp.var(student_flat, axis=0, ddof=1))          # torch var: unbiased
    return reg_err, unc


if __name__ == "__main__":
    key = jax.random.PRNGKey(0)

    test_cases = [
        # (C, H,    W,   patch, students, feat_dim)
        (4, 16, 16, 4, 3, 32),      # P = 16   -> single tiny tile
        (4, 120, 120, 4, 3, 32),    # P = 900  -> single tile, 4 padded rows (analytic fix)
        (4, 256, 256, 4, 3, 32),    # P = 4096 -> 2 shards (v7x dual-core) x 1 tile
        (4, 384, 384, 4, 3, 32),    # P = 9216 -> 2 shards x 3 tiles, rebalanced tp=1536
    ]

    for (C, H, W, p, S, F) in test_cases:
        D = C * p * p
        k_img, k_tw, k_tb, k_sw, k_sb, key = jax.random.split(key, 6)

        image = jax.random.normal(k_img, (1, C, H, W), dtype=jnp.float32)
        t_w = jax.random.normal(k_tw, (D, F), dtype=jnp.float32) * 0.1
        t_b = jax.random.normal(k_tb, (1, F), dtype=jnp.float32) * 0.1
        s_w = jax.random.normal(k_sw, (S, D, F), dtype=jnp.float32) * 0.1
        s_b = jax.random.normal(k_sb, (S, F), dtype=jnp.float32) * 0.1

        patches = extract_patches(image, p)                      # [P, D]
        ref_reg, ref_unc = reference_forward(patches, t_w, t_b, s_w, s_b)

        # f32-operand path: tight tolerance vs pure-JAX reference.
        reg32, unc32 = detector_forward(patches, t_w, t_b, s_w, s_b,
                                        use_bf16_matmul=False)
        reg32 = jax.block_until_ready(reg32)
        unc32 = jax.block_until_ready(unc32)
        assert jnp.allclose(reg32, ref_reg, rtol=1e-4, atol=1e-5), (reg32, ref_reg)
        assert jnp.allclose(unc32, ref_unc, rtol=1e-4, atol=1e-5), (unc32, ref_unc)

        # Default fast path: weights fused/cast once (hoisted), bf16 MXU operands,
        # f32 accumulation -> looser (bf16-operand) tolerance.
        w_fused, b_fused, S_, F_ = fuse_detector_weights(
            t_w, t_b, s_w, s_b, use_bf16_matmul=True)
        regbf, uncbf = detector_forward_fused(
            patches, w_fused, b_fused, num_students=S_, feat_dim=F_)
        regbf = jax.block_until_ready(regbf)
        uncbf = jax.block_until_ready(uncbf)
        assert jnp.allclose(regbf, ref_reg, rtol=3e-2, atol=1e-3), (regbf, ref_reg)
        assert jnp.allclose(uncbf, ref_unc, rtol=3e-2, atol=1e-3), (uncbf, ref_unc)

    print("KERNEL_OK")
</pallas_src>

<mosaic_0001>
module attributes {stable_mosaic.version = 11 : i64} {
  func.func @_detector_kernel(%arg0: i32, %arg1: i32, %arg2: memref<16x64xf32, #tpu.memory_space<vmem>>, %arg3: memref<64x128xf32, #tpu.memory_space<vmem>>, %arg4: memref<1x128xf32, #tpu.memory_space<vmem>>, %arg5: memref<1x1x128xf32, #tpu.memory_space<vmem>>, %arg6: memref<1x128xf32, #tpu.memory_space<vmem>>) attributes {dimension_semantics = [#tpu.dimension_semantics<parallel>, #tpu.dimension_semantics<arbitrary>], iteration_bounds = array<i64: 1, 1>, scalar_prefetch = 0 : i64, scratch_operands = 1 : i64, tpu.core_type = #tpu.core_type<tc>, window_params = [{transform_indices = @transform_0, window_bounds = array<i64: 16, 64>}, {pipeline_mode = #tpu.pipeline_mode<synchronous>, transform_indices = @transform_1, window_bounds = array<i64: 64, 128>}, {pipeline_mode = #tpu.pipeline_mode<synchronous>, transform_indices = @transform_2, window_bounds = array<i64: 1, 128>}, {transform_indices = @transform_3, window_bounds = array<i64: 1, 1, 128>}]} {
    %c0_i32 = arith.constant 0 : i32
    %0 = arith.cmpi eq, %arg1, %c0_i32 : i32
    %1 = arith.extui %0 : i1 to i32
    %c0_i32_0 = arith.constant 0 : i32
    %2 = arith.cmpi ne, %1, %c0_i32_0 : i32
    scf.if %2 {
      %cst_13 = arith.constant 0.000000e+00 : f32
      %18 = vector.broadcast %cst_13 : f32 to vector<1x128xf32>
      %c0_14 = arith.constant 0 : index
      %c0_15 = arith.constant 0 : index
      %19 = vector.load %arg6[%c0_14, %c0_15] : memref<1x128xf32, #tpu.memory_space<vmem>>, vector<1x128xf32>
      tpu.vector_store %arg6[%c0_14, %c0_15], %18 {strides = array<i32>} : memref<1x128xf32, #tpu.memory_space<vmem>>, vector<1x128xf32>,
    } else {
    }
    %c0 = arith.constant 0 : index
    %c0_1 = arith.constant 0 : index
    %3 = vector.load %arg2[%c0, %c0_1] : memref<16x64xf32, #tpu.memory_space<vmem>>, vector<16x64xf32>
    %c0_2 = arith.constant 0 : index
    %c0_3 = arith.constant 0 : index
    %4 = vector.load %arg3[%c0_2, %c0_3] : memref<64x128xf32, #tpu.memory_space<vmem>>, vector<64x128xf32>
    %cst = arith.constant dense<0.000000e+00> : vector<16x128xf32>
    %5 = tpu.matmul %3, %4, %cst {dimension_numbers = #tpu.dot_dimension_numbers<[1], [0], [0], [1], [0, 0, 1, 1], [], []>} : vector<16x64xf32>, vector<64x128xf32>, vector<16x128xf32> -> vector<16x128xf32>
    %c0_4 = arith.constant 0 : index
    %c0_5 = arith.constant 0 : index
    %6 = vector.load %arg4[%c0_4, %c0_5] : memref<1x128xf32, #tpu.memory_space<vmem>>, vector<1x128xf32>
    %7 = vector.broadcast %6 : vector<1x128xf32> to vector<16x128xf32>
    %8 = arith.addf %5, %7 : vector<16x128xf32>
    %c0_6 = arith.constant 0 : index
    %c0_7 = arith.constant 0 : index
    %9 = vector.load %arg6[%c0_6, %c0_7] : memref<1x128xf32, #tpu.memory_space<vmem>>, vector<1x128xf32>
    %10 = arith.mulf %8, %8 : vector<16x128xf32>
    %cst_8 = arith.constant dense<0.000000e+00> : vector<128xf32>
    %11 = vector.multi_reduction <add>, %10, %cst_8 [0] : vector<16x128xf32> to vector<128xf32>
    %12 = vector.shape_cast %11 : vector<128xf32> to vector<1x128xf32>
    %13 = arith.addf %9, %12 : vector<1x128xf32>
    %c0_9 = arith.constant 0 : index
    %c0_10 = arith.constant 0 : index
    %14 = vector.load %arg6[%c0_9, %c0_10] : memref<1x128xf32, #tpu.memory_space<vmem>>, vector<1x128xf32>
    tpu.vector_store %arg6[%c0_9, %c0_10], %13 {strides = array<i32>} : memref<1x128xf32, #tpu.memory_space<vmem>>, vector<1x128xf32>,
    %c0_i32_11 = arith.constant 0 : i32
    %15 = arith.cmpi eq, %arg1, %c0_i32_11 : i32
    %16 = arith.extui %15 : i1 to i32
    %c0_i32_12 = arith.constant 0 : i32
    %17 = arith.cmpi ne, %16, %c0_i32_12 : i32
    scf.if %17 {
      %c0_13 = arith.constant 0 : index
      %c0_14 = arith.constant 0 : index
      %18 = vector.load %arg6[%c0_13, %c0_14] : memref<1x128xf32, #tpu.memory_space<vmem>>, vector<1x128xf32>
      %c0_15 = arith.constant 0 : index
      %c0_16 = arith.constant 0 : index
      %c0_17 = arith.constant 0 : index
      %19 = vector.load %arg5[%c0_15, %c0_16, %c0_17] : memref<1x1x128xf32, #tpu.memory_space<vmem>>, vector<1x1x128xf32>
      %20 = vector.shape_cast %19 : vector<1x1x128xf32> to vector<1x128xf32>
      %21 = vector.shape_cast %18 : vector<1x128xf32> to vector<1x1x128xf32>
      tpu.vector_store %arg5[%c0_15, %c0_16, %c0_17], %21 {strides = array<i32>} : memref<1x1x128xf32, #tpu.memory_space<vmem>>, vector<1x1x128xf32>,
    } else {
    }
    return
  }
  func.func @transform_0(%arg0: i32, %arg1: i32) -> (i32, i32) {
    %c1_i32 = arith.constant 1 : i32
    %0 = arith.muli %arg0, %c1_i32 : i32
    %1 = arith.addi %0, %arg1 : i32
    %c0_i32 = arith.constant 0 : i32
    %c0_i32_0 = arith.constant 0 : i32
    return %1, %c0_i32 : i32, i32
  }
  func.func @transform_1(%arg0: i32, %arg1: i32) -> (i32, i32) {
    %c0_i32 = arith.constant 0 : i32
    %c0_i32_0 = arith.constant 0 : i32
    %c0_i32_1 = arith.constant 0 : i32
    return %c0_i32, %c0_i32_0 : i32, i32
  }
  func.func @transform_2(%arg0: i32, %arg1: i32) -> (i32, i32) {
    %c0_i32 = arith.constant 0 : i32
    %c0_i32_0 = arith.constant 0 : i32
    %c0_i32_1 = arith.constant 0 : i32
    return %c0_i32, %c0_i32_0 : i32, i32
  }
  func.func @transform_3(%arg0: i32, %arg1: i32) -> (i32, i32, i32) {
    %c0_i32 = arith.constant 0 : i32
    %c0_i32_0 = arith.constant 0 : i32
    %c0_i32_1 = arith.constant 0 : i32
    return %arg0, %c0_i32, %c0_i32_0 : i32, i32, i32
  }
}

</mosaic_0001>

<bundles_post_ra>
// kernel: tpu_custom_call.1
= control target key start
LH: loop header
LB: loop body
LE: loop exit
PB: predicated region body
PF: predicated region fallthrough
CT: control target
= control target key end

     0   :  { %8 = vsyncpa [#allocation4], 0  ;;  %s330_s0 = inlined_call_operand.hbm [shape: f32[16,64], index: 0, kind: input, shape index: {}]   ;;  %s331_s1 = inlined_call_operand.hbm [shape: f32[64,128], index: 1, kind: input, shape index: {}]   ;;  %s332_s2 = inlined_call_operand.vmem [shape: f32[1,128], index: 2, kind: input, shape index: {}]   ;;  %s333_s3 = inlined_call_operand.hbm [shape: f32[1,1,128], index: 3, kind: output, shape index: {}]  }
   0x1   :  { %9 = vsyncpa [#allocation7], 0 }
   0x2   :  { %10 = vsyncpa [#allocation5], 0  ;;  %s290_s12 = smov [#allocation3]  }
   0x3   :  { %s20_s13 = sshll.u32 %s290_s12, 4  ;;  %s21_s13 = int_to_ptr.vmem [resolvable:$true] %s20_s13 }
   0x4   :  { %s232_s14 = scalar_lea.vmem %s21_s13, 256  ;;  %p237_p1 = scmp.lt.s32.totalorder %s21_s13, %s21_s13 }
   0x5   :  { %p233_p0 = scmp.ne.s32.totalorder %s21_s13, %s232_s14  ;;  %p238_p2 = scmp.lt.s32.totalorder %s232_s14, %s232_s14 }
   0x7   :  { %p239_p3 = por %p238_p2, %p237_p1 }
   0x9   :  { %p240_p4 = pnand %p239_p3, %p233_p0 }
   0xb   :  { %243 = shalt.err (!%p240_p4)
}
   0xc   :  { %s291_s15 = smov 128   ;;  %s292_s16 = smov 8  }
   0xd   :  { %26 = dma.hbm_to_vmem [thread:$0]  %s330_s0, 256, %s21_s13, [#allocation4], %s291_s15, %s291_s15, %s292_s16  }
   0xe   :  { %s293_s19 = smov [#allocation6]  }
   0xf   :  { %s32_s20 = sshll.u32 %s293_s19, 4  ;;  %s33_s20 = int_to_ptr.vmem [resolvable:$true] %s32_s20 }
  0x10   :  { %s252_s21 = scalar_lea.vmem %s33_s20, 1024  ;;  %p257_p6 = scmp.lt.s32.totalorder %s33_s20, %s33_s20 }
  0x11   :  { %p253_p5 = scmp.ne.s32.totalorder %s33_s20, %s252_s21  ;;  %p258_p7 = scmp.lt.s32.totalorder %s252_s21, %s252_s21 }
  0x13   :  { %p259_p8 = por %p258_p7, %p257_p6 }
  0x15   :  { %p260_p9 = pnand %p259_p8, %p253_p5 }
  0x17   :  { %263 = shalt.err (!%p260_p9)
}
  0x18   :  { %38 = dma.hbm_to_vmem [thread:$0]  %s331_s1, 1024, %s33_s20, [#allocation7], %s291_s15, %s291_s15, %s292_s16  }
  0x19   :  { %284 = dma.done.wait [#allocation4], 256  }
  0x1a   :  { %285 = vsyncadd [#allocation4], 4294967040 }
  0x1b   :  { %286 = dma.done.wait [#allocation7], 1024  }
  0x1c   :  { %287 = vsyncadd [#allocation7], 4294966272  ;;  %v63_v0 = vld [vmem:[#allocation6 + $0x38] sm:$0xff]  ;;  %v62_v1 = vld [vmem:[#allocation6 + $0x30] sm:$0xff]  ;;  %vm71_vm0 = vcmask 523264   ;;  %v294_v10 = vmov 0.0  }
  0x1d   :  { %199 = vmatprep.subr.mxu0 %v63_v0  ;;  %v61_v2 = vld [vmem:[#allocation6 + $0x28] sm:$0xff]  ;;  %v54_v3 = vld [vmem:[#allocation3] sm:$0xff]  ;;  %v60_v4 = vld [vmem:[#allocation6 + $0x20] sm:$0xff]  ;;  %53 = vst [vmem:[#allocation2] sm:$0x1] %v294_v10  ;;  %s295_s24 = smov [#allocation8]  }
  0x1e   :  { %200 = vmatpush3.msra.mxu0 %v63_v0  ;;  %215 = vmatprep.mubr.msk.f32.mxu0 %vm71_vm0, %v54_v3  ;;  %v59_v5 = vld [vmem:[#allocation6 + $0x18] sm:$0xff]  ;;  %v58_v6 = vld [vmem:[#allocation6 + $0x10] sm:$0xff]  ;;  %v57_v7 = vld [vmem:[#allocation6 + $0x8] sm:$0xff]  ;;  %s176_s25 = sshll.u32 %s295_s24, 4  ;;  %s177_s25 = int_to_ptr.vmem [resolvable:$true] %s176_s25 }
  0x1f   :  { %201 = vmatprep.subr.mxu0 %v62_v1  ;;  %v56_v8 = vld [vmem:[#allocation6] sm:$0xff]  ;;  %v55_v9 = vld [vmem:[#allocation3 + $0x8] sm:$0xff]  ;;  %v186_v11 = vld [vmem:[%s332_s2] ss:$0 sm:$0xff]  ;;  %s264_s2 = scalar_lea.vmem %s177_s25, 16  ;;  %s268_s26 = scalar_lea.vmem %s177_s25, 32 }
  0x20   :  { %202 = vmatpush3.msra.mxu0 %v62_v1  ;;  %p265_p10 = scmp.ne.s32.totalorder %s177_s25, %s264_s2  ;;  %p269_p11 = scmp.lt.s32.totalorder %s177_s25, %s177_s25 }
  0x21   :  { %203 = vmatprep.subr.mxu0 %v61_v2  ;;  %p270_p12 = scmp.lt.s32.totalorder %s268_s26, %s264_s2 }
  0x22   :  { %204 = vmatpush3.msra.mxu0 %v61_v2 }
  0x23   :  { %205 = vmatprep.subr.mxu0 %v60_v4  ;;  %p271_p13 = por %p270_p12, %p269_p11 }
  0x24   :  { %206 = vmatpush3.msra.mxu0 %v60_v4  ;;  %v153_v24 = vld [vmem:[#allocation2] sm:$0x1] }
  0x25   :  { %207 = vmatprep.subr.mxu0 %v59_v5  ;;  %p272_p0 = pnand %p271_p13, %p265_p10 }
  0x26   :  { %208 = vmatpush3.msra.mxu0 %v59_v5 }
  0x27   :  { %209 = vmatprep.subr.mxu0 %v58_v6 }
  0x28   :  { %210 = vmatpush3.msra.mxu0 %v58_v6 }
  0x29   :  { %211 = vmatprep.subr.mxu0 %v57_v7 }
  0x2a   :  { %212 = vmatpush3.msra.mxu0 %v57_v7 }
  0x2b   :  { %213 = vmatprep.subr.mxu0 %v56_v8 }
  0x2c   :  { %214 = vmatpush3.msra.mxu0 %v56_v8 }
  0x2d   :  { %216 = vmatmul.mubr.msk.f32.vlgmr.msra.gmra.mxu0 %vm71_vm0, %v55_v9 }
  0xed   :  { %v217_v12 = vpop.f32.mrf.mxu0 }
  0xee   :  { %v150_v13 = vadd.f32 %v217_v12, %v186_v11 }
  0xef   :  { %v144_v14 = vpop.f32.mrf.mxu0 }
  0xf0   :  { %v145_v15 = vadd.f32 %v186_v11, %v144_v14  ;;  %v155_v16 = vmul.f32 %v150_v13, %v150_v13 }
  0xf2   :  { %v154_v17 = vmul.f32 %v145_v15, %v145_v15 }
  0xf4   :  { %v156_v18 = vadd.f32 %v155_v16, %v154_v17 }
  0xf6   :  { %v157_v19 = vrot.slane %v156_v18, 4 }
  0xf8   :  { %v158_v20 = vadd.f32 %v157_v19, %v156_v18 }
  0xfa   :  { %v159_v21 = vrot.slane %v158_v20, 2 }
  0xfc   :  { %v160_v22 = vadd.f32 %v159_v21, %v158_v20 }
  0xfe   :  { %v161_v23 = vrot.slane %v160_v22, 1 }
 0x100   :  { %v162_v25 = vadd.f32 %v161_v23, %v160_v22 }
 0x102   :  { %v163_v26 = vadd.f32 %v162_v25, %v153_v24 }
 0x104   :  { %164 = vst [vmem:[#allocation2] sm:$0x1] %v163_v26 }
 0x10b   :  { %v168_v27 = vld [vmem:[#allocation2] sm:$0x1] }
 0x10c   :  { %169 = vst [vmem:[#allocation8] sm:$0x1] %v168_v27 }
 0x10d   :  { %275 = shalt.err (!%p272_p0)
}
 0x10e   :  { %179 = dma.vmem_to_hbm [thread:$0]  %s177_s25, 16, %s333_s3, [#allocation5]  }
 0x10f   :  { %288 = dma.done.wait [#allocation5], 16  }
 0x110   :  { %289 = vsyncadd [#allocation5], 4294967280 }
 0x111   :  { %183 = vsyncpa [#allocation4], 1 }
 0x112   :  { %184 = vsyncpa [#allocation7], 1 }
 0x113   :  { %185 = vsyncpa [#allocation5], 1 }

</bundles_post_ra>
